<compile_context>
chip_gen: v6e
topology: v6e:2x2x1
jax: 0.10.0
libtpu: 0.0.40
codegen_flags: <defaults>
</compile_context>

<pallas_src>
import functools

import jax
import jax.numpy as jnp
from jax.experimental import pallas as pl
from jax.experimental.pallas import tpu as pltpu

LN_EPS = 1e-5


def final_layer_kernel(x_ref, gamma_ref, w_ref, b_ref, o_ref, xn_ref):
    # x_ref:     (TM, H)   row tile of flattened (B*S, H) input
    # gamma_ref: (1, H)    LayerNorm scale (selected per `mode` in the wrapper)
    # w_ref:     (H, TN)   Linear weight tile, pre-transposed, bf16
    # b_ref:     (1, TN)   Linear bias tile (f32)
    # o_ref:     (TM, TN)  output tile
    # xn_ref:    (TM, H)   VMEM scratch: normalized rows in the matmul dtype,
    #                      computed once per row tile (j == 0), reused for all j.

    @pl.when(pl.program_id(1) == 0)
    def _compute_layernorm():
        x = x_ref[...].astype(jnp.float32)
        h = x.shape[-1]
        mean = jnp.sum(x, axis=-1, keepdims=True) * (1.0 / h)
        xc = x - mean
        var = jnp.sum(xc * xc, axis=-1, keepdims=True) * (1.0 / h)
        inv = jax.lax.rsqrt(var + LN_EPS)
        xn = xc * inv * gamma_ref[...].astype(jnp.float32)
        xn_ref[...] = xn.astype(xn_ref.dtype)

    # (TM, H) @ (H, TN) on the MXU, f32 accumulate.
    y = jnp.dot(xn_ref[...], w_ref[...], preferred_element_type=jnp.float32)
    y = y + b_ref[...].astype(jnp.float32)
    o_ref[...] = y.astype(o_ref.dtype)


def _round_up(n, m):
    return ((n + m - 1) // m) * m


def _vmem_capacity_bytes():
    try:
        return int(pltpu.get_tpu_info().vmem_capacity_bytes)
    except Exception:
        return 64 << 20  # conservative fallback (v7x-sized)


@functools.partial(jax.jit, static_argnames=("mode", "tm", "tn"))
def transformer_final_layer(x, params, mode, tm=None, tn=None):
    """x: (B, S, H) -> (B, S, O).  mode in {'ar', 'diff'} selects the LayerNorm.

    params["linear_weight_t"] must be the nn.Linear weight pre-transposed to
    (H, O) and cast to the desired MXU dtype (bf16) at parameter-load time.
    """
    if mode == "ar":
        gamma = params["ln_ar_weight"]
    elif mode == "diff":
        gamma = params["ln_diff_weight"]
    else:
        raise ValueError(mode)

    w_t = params["linear_weight_t"]  # (H, O), already transposed, bf16
    bias = params["linear_bias"]     # (O,), f32

    B, S, H = x.shape
    O = w_t.shape[1]
    N = B * S

    cap = _vmem_capacity_bytes()
    # Per-generation defaults: 128 MiB parts (v5e/v6e) can afford large row
    # tiles (v6e roofline needs tm >~ 704 to be MXU-bound); 64 MiB parts (v7x)
    # reach compute-bound earlier and must respect the smaller VMEM.
    if tm is None:
        tm = 768 if cap >= (100 << 20) else 384
    if tn is None:
        tn = 1024 if cap >= (100 << 20) else 512

    # --- Row tiling: pad N to a multiple of the row tile (no divisibility
    # constraint on B*S).  Padded rows are zeros -> LN gives zeros -> sliced off.
    tm_eff = min(tm, _round_up(N, 8))
    n_pad = _round_up(N, tm_eff)

    # --- Output tiling: lane-dense (multiple of 128) even for small O.
    if O <= tn:
        tn_eff = _round_up(O, 128)
        o_pad = tn_eff
    else:
        assert tn % 128 == 0, "tn must be a multiple of 128 when tiling O"
        tn_eff = tn
        o_pad = _round_up(O, tn_eff)

    x2d = x.reshape(N, H)
    if n_pad != N:
        x2d = jnp.pad(x2d, ((0, n_pad - N), (0, 0)))
    gamma2d = gamma.reshape(1, H)
    w_p = w_t
    b_p = bias.reshape(1, O)
    if o_pad != O:
        w_p = jnp.pad(w_p, ((0, 0), (0, o_pad - O)))
        b_p = jnp.pad(b_p, ((0, 0), (0, o_pad - O)))

    grid = (n_pad // tm_eff, o_pad // tn_eff)

    x_item = jnp.dtype(x.dtype).itemsize
    w_item = jnp.dtype(w_p.dtype).itemsize
    out_item = jnp.dtype(x.dtype).itemsize
    needed = (
        2 * tm_eff * H * x_item          # x tile, double-buffered
        + 2 * H * tn_eff * w_item        # weight tile, double-buffered
        + 2 * tm_eff * tn_eff * out_item  # output tile, double-buffered
        + 2 * (H + tn_eff) * 4           # gamma + bias blocks
        + tm_eff * H * w_item            # LN scratch (single buffer)
        + 3 * tm_eff * H * 4             # in-kernel f32 LN temporaries
    )
    vmem_limit = max(32 << 20, min(int(needed * 5 // 4), cap - (4 << 20)))

    out2d = pl.pallas_call(
        final_layer_kernel,
        out_shape=jax.ShapeDtypeStruct((n_pad, o_pad), x.dtype),
        grid_spec=pltpu.PrefetchScalarGridSpec(
            num_scalar_prefetch=0,
            grid=grid,
            in_specs=[
                pl.BlockSpec((tm_eff, H), lambda i, j: (i, 0)),   # x row tile
                pl.BlockSpec((1, H), lambda i, j: (0, 0)),        # gamma (resident)
                pl.BlockSpec((H, tn_eff), lambda i, j: (0, j)),   # W^T column tile
                pl.BlockSpec((1, tn_eff), lambda i, j: (0, j)),   # bias tile
            ],
            out_specs=pl.BlockSpec((tm_eff, tn_eff), lambda i, j: (i, j)),
            scratch_shapes=[pltpu.VMEM((tm_eff, H), w_p.dtype)],  # cached LN rows
        ),
        compiler_params=pltpu.CompilerParams(
            # j must iterate sequentially per row tile so the LN scratch written
            # at j == 0 is reused for all j; row tiles shard across TensorCores.
            dimension_semantics=("parallel", "arbitrary"),
            vmem_limit_bytes=int(vmem_limit),
        ),
    )(x2d, gamma2d, w_p, b_p)

    return out2d[:N, :O].reshape(B, S, O)


def reference_final_layer(x, params, mode):
    gamma = params["ln_ar_weight"] if mode == "ar" else params["ln_diff_weight"]
    xf = x.astype(jnp.float32)
    mean = jnp.mean(xf, axis=-1, keepdims=True)
    var = jnp.mean((xf - mean) ** 2, axis=-1, keepdims=True)
    xn = (xf - mean) * jax.lax.rsqrt(var + LN_EPS) * gamma.astype(jnp.float32)
    w = params["linear_weight_t"]
    # Mirror the kernel's MXU operand dtype (bf16 operands, f32 accumulate).
    y = jnp.dot(xn.astype(w.dtype).astype(jnp.float32), w.astype(jnp.float32))
    y = y + params["linear_bias"].astype(jnp.float32)
    return y.astype(x.dtype)


def _make_params(key, H, O):
    kg1, kg2, kw, kb = jax.random.split(key, 4)
    w = 0.1 * jax.random.normal(kw, (O, H), dtype=jnp.float32)  # PyTorch layout (O, H)
    return {
        # LayerNorm weights are ones in the module's __init__; perturb slightly
        # (deterministically) so the two norms are distinguishable.
        "ln_ar_weight": jnp.ones((H,), jnp.float32)
        + 0.05 * jax.random.normal(kg1, (H,), jnp.float32),
        "ln_diff_weight": jnp.ones((H,), jnp.float32)
        + 0.05 * jax.random.normal(kg2, (H,), jnp.float32),
        # Module zero-inits these; use deterministic small values instead so the
        # output is non-trivial.  Transpose + bf16 cast ONCE here (param setup).
        "linear_weight_t": w.T.astype(jnp.bfloat16),  # (H, O), bf16 MXU path
        "linear_bias": 0.1 * jax.random.normal(kb, (O,), jnp.float32),
    }


if __name__ == "__main__":
    key = jax.random.PRNGKey(0)
    k0, k1, k2, k3 = jax.random.split(key, 4)

    ok = True

    # Case 1: small shapes matching typical module usage (B, S, H) -> (B, S, O).
    B, S, H, O = 2, 8, 32, 16
    x = jax.random.normal(k0, (B, S, H), dtype=jnp.float32)
    params = _make_params(k1, H, O)
    for mode in ("ar", "diff"):
        out = jax.block_until_ready(transformer_final_layer(x, params, mode))
        ref = reference_final_layer(x, params, mode)
        if out.shape != (B, S, O) or not jnp.allclose(out, ref, atol=1e-3, rtol=1e-3):
            ok = False

    # Case 2: exercises the O-dimension grid axis (LN cached across j) + padding.
    B2, S2, H2, O2 = 2, 24, 64, 160
    x2 = jax.random.normal(k2, (B2, S2, H2), dtype=jnp.float32)
    params2 = _make_params(k3, H2, O2)
    out2 = jax.block_until_ready(
        transformer_final_layer(x2, params2, "ar", tm=256, tn=128))
    ref2 = reference_final_layer(x2, params2, "ar")
    if out2.shape != (B2, S2, O2) or not jnp.allclose(out2, ref2, atol=1e-3, rtol=1e-3):
        ok = False

    if ok:
        print("KERNEL_OK")
</pallas_src>

<mosaic_0001>
module attributes {stable_mosaic.version = 11 : i64} {
  func.func @final_layer_kernel(%arg0: i32, %arg1: i32, %arg2: memref<16x32xf32, #tpu.memory_space<vmem>>, %arg3: memref<1x32xf32, #tpu.memory_space<vmem>>, %arg4: memref<32x128xbf16, #tpu.memory_space<vmem>>, %arg5: memref<1x128xf32, #tpu.memory_space<vmem>>, %arg6: memref<16x128xf32, #tpu.memory_space<vmem>>, %arg7: memref<16x32xbf16, #tpu.memory_space<vmem>>) attributes {dimension_semantics = [#tpu.dimension_semantics<parallel>, #tpu.dimension_semantics<arbitrary>], iteration_bounds = array<i64: 1, 1>, scalar_prefetch = 0 : i64, scratch_operands = 1 : i64, tpu.core_type = #tpu.core_type<tc>, window_params = [{transform_indices = @transform_0, window_bounds = array<i64: 16, 32>}, {pipeline_mode = #tpu.pipeline_mode<synchronous>, transform_indices = @transform_1, window_bounds = array<i64: 1, 32>}, {transform_indices = @transform_2, window_bounds = array<i64: 32, 128>}, {transform_indices = @transform_3, window_bounds = array<i64: 1, 128>}, {transform_indices = @transform_4, window_bounds = array<i64: 16, 128>}]} {
    %c0_i32 = arith.constant 0 : i32
    %0 = arith.cmpi eq, %arg1, %c0_i32 : i32
    %1 = arith.extui %0 : i1 to i32
    %c0_i32_0 = arith.constant 0 : i32
    %2 = arith.cmpi ne, %1, %c0_i32_0 : i32
    scf.if %2 {
      %c0_8 = arith.constant 0 : index
      %c0_9 = arith.constant 0 : index
      %10 = vector.load %arg2[%c0_8, %c0_9] : memref<16x32xf32, #tpu.memory_space<vmem>>, vector<16x32xf32>
      %cst_10 = arith.constant dense<0.000000e+00> : vector<16xf32>
      %11 = vector.multi_reduction <add>, %10, %cst_10 [1] : vector<16x32xf32> to vector<16xf32>
      %12 = vector.shape_cast %11 : vector<16xf32> to vector<16x1xf32>
      %cst_11 = arith.constant 3.125000e-02 : f32
      %13 = vector.broadcast %cst_11 : f32 to vector<16x1xf32>
      %14 = arith.mulf %12, %13 : vector<16x1xf32>
      %15 = vector.broadcast %14 : vector<16x1xf32> to vector<16x32xf32>
      %16 = arith.subf %10, %15 : vector<16x32xf32>
      %17 = arith.mulf %16, %16 : vector<16x32xf32>
      %cst_12 = arith.constant dense<0.000000e+00> : vector<16xf32>
      %18 = vector.multi_reduction <add>, %17, %cst_12 [1] : vector<16x32xf32> to vector<16xf32>
      %19 = vector.shape_cast %18 : vector<16xf32> to vector<16x1xf32>
      %cst_13 = arith.constant 3.125000e-02 : f32
      %20 = vector.broadcast %cst_13 : f32 to vector<16x1xf32>
      %21 = arith.mulf %19, %20 : vector<16x1xf32>
      %cst_14 = arith.constant 9.99999974E-6 : f32
      %22 = vector.broadcast %cst_14 : f32 to vector<16x1xf32>
      %23 = arith.addf %21, %22 : vector<16x1xf32>
      %24 = math.rsqrt %23 : vector<16x1xf32>
      %25 = vector.broadcast %24 : vector<16x1xf32> to vector<16x32xf32>
      %26 = arith.mulf %16, %25 : vector<16x32xf32>
      %c0_15 = arith.constant 0 : index
      %c0_16 = arith.constant 0 : index
      %27 = vector.load %arg3[%c0_15, %c0_16] : memref<1x32xf32, #tpu.memory_space<vmem>>, vector<1x32xf32>
      %28 = vector.broadcast %27 : vector<1x32xf32> to vector<16x32xf32>
      %29 = arith.mulf %26, %28 : vector<16x32xf32>
      %30 = arith.truncf %29 : vector<16x32xf32> to vector<16x32xbf16>
      %c0_17 = arith.constant 0 : index
      %c0_18 = arith.constant 0 : index
      %31 = vector.load %arg7[%c0_17, %c0_18] : memref<16x32xbf16, #tpu.memory_space<vmem>>, vector<16x32xbf16>
      tpu.vector_store %arg7[%c0_17, %c0_18], %30 {strides = array<i32>} : memref<16x32xbf16, #tpu.memory_space<vmem>>, vector<16x32xbf16>,
    } else {
    }
    %c0 = arith.constant 0 : index
    %c0_1 = arith.constant 0 : index
    %3 = vector.load %arg7[%c0, %c0_1] : memref<16x32xbf16, #tpu.memory_space<vmem>>, vector<16x32xbf16>
    %c0_2 = arith.constant 0 : index
    %c0_3 = arith.constant 0 : index
    %4 = vector.load %arg4[%c0_2, %c0_3] : memref<32x128xbf16, #tpu.memory_space<vmem>>, vector<32x128xbf16>
    %cst = arith.constant dense<0.000000e+00> : vector<16x128xf32>
    %5 = tpu.matmul %3, %4, %cst {dimension_numbers = #tpu.dot_dimension_numbers<[1], [0], [0], [1], [0, 0, 1, 1], [], []>} : vector<16x32xbf16>, vector<32x128xbf16>, vector<16x128xf32> -> vector<16x128xf32>
    %c0_4 = arith.constant 0 : index
    %c0_5 = arith.constant 0 : index
    %6 = vector.load %arg5[%c0_4, %c0_5] : memref<1x128xf32, #tpu.memory_space<vmem>>, vector<1x128xf32>
    %7 = vector.broadcast %6 : vector<1x128xf32> to vector<16x128xf32>
    %8 = arith.addf %5, %7 : vector<16x128xf32>
    %c0_6 = arith.constant 0 : index
    %c0_7 = arith.constant 0 : index
    %9 = vector.load %arg6[%c0_6, %c0_7] : memref<16x128xf32, #tpu.memory_space<vmem>>, vector<16x128xf32>
    tpu.vector_store %arg6[%c0_6, %c0_7], %8 {strides = array<i32>} : memref<16x128xf32, #tpu.memory_space<vmem>>, vector<16x128xf32>,
    return
  }
  func.func @transform_0(%arg0: i32, %arg1: i32) -> (i32, i32) {
    %c0_i32 = arith.constant 0 : i32
    %c0_i32_0 = arith.constant 0 : i32
    return %arg0, %c0_i32 : i32, i32
  }
  func.func @transform_1(%arg0: i32, %arg1: i32) -> (i32, i32) {
    %c0_i32 = arith.constant 0 : i32
    %c0_i32_0 = arith.constant 0 : i32
    %c0_i32_1 = arith.constant 0 : i32
    return %c0_i32, %c0_i32_0 : i32, i32
  }
  func.func @transform_2(%arg0: i32, %arg1: i32) -> (i32, i32) {
    %c0_i32 = arith.constant 0 : i32
    %c0_i32_0 = arith.constant 0 : i32
    return %c0_i32, %arg1 : i32, i32
  }
  func.func @transform_3(%arg0: i32, %arg1: i32) -> (i32, i32) {
    %c0_i32 = arith.constant 0 : i32
    %c0_i32_0 = arith.constant 0 : i32
    return %c0_i32, %arg1 : i32, i32
  }
  func.func @transform_4(%arg0: i32, %arg1: i32) -> (i32, i32) {
    %c0_i32 = arith.constant 0 : i32
    return %arg0, %arg1 : i32, i32
  }
}

</mosaic_0001>

<bundles_post_ra>
// kernel: transformer_final_layer.1
= control target key start
LH: loop header
LB: loop body
LE: loop exit
PB: predicated region body
PF: predicated region fallthrough
CT: control target
= control target key end

     0   :  { %vm24_vm0 = vcmask 261120   ;;  %v182_v15 = vmov 0.0   ;;  %vm183_vm1 = vmmov 0   ;;  %vm68_vm2 = vcmask 257024   ;;  %s238_s0 = inlined_call_operand.vmem [shape: f32[16,32], index: 0, kind: input, shape index: {}]   ;;  %s239_s2 = inlined_call_operand.vmem [shape: bf16[32,128], index: 2, kind: input, shape index: {}]   ;;  %s240_s1 = inlined_call_operand.vmem [shape: f32[1,32], index: 1, kind: input, shape index: {}]   ;;  %s241_s3 = inlined_call_operand.vmem [shape: f32[1,128], index: 3, kind: input, shape index: {}]   ;;  %s242_s4 = inlined_call_operand.vmem [shape: f32[16,128], index: 4, kind: output, shape index: {}]  }
   0x1   :  { %v22_v0 = vld [vmem:[%s238_s0] sm:$0xff]  ;;  %v23_v1 = vld [vmem:[%s238_s0 + $0x8] sm:$0xff]  ;;  %165 = vmatprep.subr.bf16.mxu0 %v182_v15  ;;  %169 = vmatprep.mubr.msk.bf16.mxu0 %vm183_vm1, %v182_v15 }
   0x2   :  { %v25_v2 = vsel %vm24_vm0, %v22_v0, 0.0  ;;  %v28_v3 = vsel %vm24_vm0, %v23_v1, 0.0  ;;  %v175_v14 = vld [vmem:[%s239_s2 + $0x8] sm:$0xff]   ;;  %v176_v16 = vld [vmem:[%s239_s2] sm:$0xff]  }
   0x3   :  { %26 = vadd.xlane.f32.xlu0 %v25_v2  ;;  %166 = vmatpush3.bf16.msra.mxu0 %v175_v14  ;;  %v152_v24 = vld [vmem:[%s240_s1] ss:$0 sm:$0xff] }
   0x4   :  { %167 = vmatprep.subr.bf16.mxu0 %v182_v15  ;;  %v155_v33 = vld [vmem:[%s241_s3] ss:$0 sm:$0xff] }
   0x7   :  { %29 = vadd.xlane.f32.xlu0 %v28_v3  ;;  %168 = vmatpush3.bf16.msra.mxu0 %v176_v16 }
  0x8c   :  { %v27_v4 = vpop.xlane.xlu0 %26 }
  0x8d   :  { %v31_v5 = vmul.f32 0.03125, %v27_v4 }
  0x8f   :  { %v33_v6 = vsub.f32 %v22_v0, %v31_v5 }
  0x90   :  { %v30_v7 = vpop.xlane.xlu0 %29 }
  0x91   :  { %v32_v8 = vmul.f32 0.03125, %v30_v7  ;;  %v35_v9 = vmul.f32 %v33_v6, %v33_v6 }
  0x93   :  { %v34_v10 = vsub.f32 %v23_v1, %v32_v8  ;;  %v37_v11 = vsel %vm24_vm0, %v35_v9, 0.0 }
  0x94   :  { %38 = vadd.xlane.f32.xlu1 %v37_v11 }
  0x95   :  { %v36_v12 = vmul.f32 %v34_v10, %v34_v10 }
  0x97   :  { %v40_v13 = vsel %vm24_vm0, %v36_v12, 0.0 }
  0x98   :  { %41 = vadd.xlane.f32.xlu1 %v40_v13 }
 0x11d   :  { %v39_v17 = vpop.xlane.xlu1 %38 }
 0x11e   :  { %v43_v18 = vmul.f32 0.03125, %v39_v17 }
 0x120   :  { %v45_v19 = vadd.f32 1e-05, %v43_v18 }
 0x121   :  { %v42_v20 = vpop.xlane.xlu1 %41 }
 0x122   :  { %178 = vrsqrt.f32 %v45_v19  ;;  %v44_v21 = vmul.f32 0.03125, %v42_v20 }
 0x124   :  { %v46_v22 = vadd.f32 1e-05, %v44_v21 }
 0x126   :  { %180 = vrsqrt.f32 %v46_v22 }
 0x12f   :  { %v179_v23 = vpop.eup %178 }
 0x130   :  { %v49_v25 = vmul.f32 %v179_v23, %v33_v6 }
 0x132   :  { %v58_v26 = vmul.f32 %v152_v24, %v49_v25 }
 0x133   :  { %v181_v27 = vpop.eup %180 }
 0x134   :  { %v160_v28 = vpack.c.bf16 %v58_v26, %v58_v26  ;;  %v50_v29 = vmul.f32 %v181_v27, %v34_v10 }
 0x136   :  { %69 = vst.msk [vmem:[#allocation2] sm:$0xf] %vm68_vm2, %v160_v28  ;;  %v59_v30 = vmul.f32 %v152_v24, %v50_v29 }
 0x138   :  { %v161_v31 = vpack.c.bf16 %v59_v30, %v59_v30 }
 0x13a   :  { %70 = vst.msk [vmem:[#allocation2 + $0x4] sm:$0xf] %vm68_vm2, %v161_v31 }
 0x141   :  { %v177_v32 = vld [vmem:[#allocation2] sm:$0xff]  }
 0x142   :  { %170 = vmatmul.mubr.msk.bf16.vlgmr.msra.gmra.mxu0 %vm24_vm0, %v177_v32 }
 0x202   :  { %v139_v34 = vpop.f32.mrf.mxu0 }
 0x203   :  { %v140_v35 = vadd.f32 %v155_v33, %v139_v34 }
 0x204   :  { %v171_v36 = vpop.f32.mrf.mxu0 }
 0x205   :  { %146 = vst [vmem:[%s242_s4] sm:$0xff] %v140_v35 }
 0x206   :  { %v142_v37 = vpop.f32.mrf.mxu0 }
 0x207   :  { %v143_v38 = vadd.f32 %v155_v33, %v142_v37 }
 0x208   :  { %v172_v39 = vpop.f32.mrf.mxu0 }
 0x209   :  { %147 = vst [vmem:[%s242_s4 + $0x8] sm:$0xff] %v143_v38 }

</bundles_post_ra>
